<compile_context>
chip_gen: v7x
topology: tpu7x:2x2x1
jax: 0.10.0
libtpu: 0.0.40
codegen_flags: <defaults>
</compile_context>

<pallas_src>
import jax
import jax.numpy as jnp
from jax.experimental import pallas as pl
from jax.experimental.pallas import tpu as pltpu

_LANE = 128
_MAX_TB = 4096  # batch-tile cap (sweet spot of the 512/1024/2048/4096 sweep)


def _choose_tb(batch):
    """Pick the lane-axis batch tile.

    Large tiles amortize the ~0.35 us per-grid-step overhead; the tile is
    chosen so that >= 2 grid steps exist whenever the (lane-padded) batch
    allows it, keeping both v7x TensorCores populated, with minimal padding.
    """
    b_lanes = pl.cdiv(batch, _LANE) * _LANE
    if b_lanes <= _LANE:
        return _LANE
    n_tiles = max(2, pl.cdiv(b_lanes, _MAX_TB))
    return pl.cdiv(pl.cdiv(b_lanes, n_tiles), _LANE) * _LANE


def _layer1_dtype():
    """bf16 on chips with bf16 VALUs (v6e / v7x and newer); f32 on v5e and
    older (no bf16 VPU there -> bf16 elementwise would be emulated)."""
    try:
        kind = jax.devices()[0].device_kind.lower()
    except Exception:
        return jnp.bfloat16
    if any(tag in kind for tag in ("v2", "v3", "v4", "v5")):
        return jnp.float32
    return jnp.bfloat16


def _make_kernel(l1_dtype):
    def kernel(xT_ref, w1_ref, b1_ref, w2_ref, b2_ref, w3_ref, b3_ref, o_ref):
        # xT_ref: [3, TB] bf16      w1_ref: [64, 3] l1    b1_ref: [64, 1] l1
        # w2_ref: [32, 64] bf16     b2_ref: [32, 1] f32
        # w3_ref: [32, 1]  f32      b3_ref: [1, 1]  f32   o_ref: [1, TB] f32
        xT = xT_ref[...].astype(l1_dtype)                       # [3, TB]
        w1 = w1_ref[...]                                        # [64, 3]

        # ---- Layer 1 (3 -> 64): three broadcast FMAs on the VPU ----
        # TODO(synk): benchmark the degenerate-K=3 MXU variant
        #   relu(dot(w1_bf16, xT_bf16, preferred_element_type=f32) + b1)
        # against this VPU path (the MXU has slack on every generation).
        h1 = (w1[:, 0:1] * xT[0:1, :]
              + w1[:, 1:2] * xT[1:2, :]
              + w1[:, 2:3] * xT[2:3, :]
              + b1_ref[...])                                    # [64, TB]
        h1 = jnp.maximum(h1, 0.0).astype(jnp.bfloat16)

        # ---- Layer 2 (64 -> 32): MXU, bf16 inputs, f32 accumulation ----
        h2 = jnp.dot(w2_ref[...], h1, preferred_element_type=jnp.float32)
        h2 = jnp.maximum(h2 + b2_ref[...], 0.0)                 # [32, TB]

        # ---- Layer 3 (32 -> 1): elementwise multiply + sublane reduce (XLU) ----
        o_ref[...] = (jnp.sum(w3_ref[...] * h2, axis=0, keepdims=True)
                      + b3_ref[...]).astype(o_ref.dtype)

    return kernel


@jax.jit
def regression_model_forward(x, params):
    """x: [B, 3] float32. Returns [B, 1] float32."""
    w1, b1, w2, b2, w3, b3 = params
    batch = x.shape[0]
    tb = _choose_tb(batch)
    n_tiles = pl.cdiv(batch, tb)
    b_pad = n_tiles * tb
    l1_dtype = _layer1_dtype()

    # Lane-dense, feature-major layout: batch on lanes, features on sublanes.
    # Under jit the cast + transpose + pad fuse into a single copy feeding the
    # custom call (and the final slice + transpose fuse on the way out).
    xT = jnp.pad(x.astype(jnp.bfloat16).T, ((0, 0), (0, b_pad - batch)))  # [3, b_pad]

    w1c = w1.astype(l1_dtype)
    b1c = b1.astype(l1_dtype)
    w2c = w2.astype(jnp.bfloat16)

    weight_bytes = (w1c.size * w1c.dtype.itemsize + b1c.size * b1c.dtype.itemsize
                    + w2c.size * 2 + b2.size * 4 + w3.size * 4 + b3.size * 4)
    cost = pl.CostEstimate(
        flops=2 * b_pad * (3 * 64 + 64 * 32 + 32),
        transcendentals=0,
        bytes_accessed=b_pad * (3 * 2 + 1 * 4) + weight_bytes)

    out = pl.pallas_call(
        _make_kernel(l1_dtype),
        out_shape=jax.ShapeDtypeStruct((1, b_pad), jnp.float32),
        grid=(n_tiles,),
        in_specs=[
            pl.BlockSpec((3, tb), lambda i: (0, i)),     # x tile (pipelined)
            pl.BlockSpec((64, 3), lambda i: (0, 0)),     # W1 (resident)
            pl.BlockSpec((64, 1), lambda i: (0, 0)),     # b1
            pl.BlockSpec((32, 64), lambda i: (0, 0)),    # W2 (resident, bf16)
            pl.BlockSpec((32, 1), lambda i: (0, 0)),     # b2
            pl.BlockSpec((32, 1), lambda i: (0, 0)),     # W3^T
            pl.BlockSpec((1, 1), lambda i: (0, 0)),      # b3
        ],
        out_specs=pl.BlockSpec((1, tb), lambda i: (0, i)),
        compiler_params=pltpu.CompilerParams(
            dimension_semantics=("parallel",)),  # megacore sharding (v7x)
        cost_estimate=cost,
    )(xT, w1c, b1c, w2c, b2, w3, b3)

    return out[:, :batch].T  # [B, 1]


def init_params(key):
    # PyTorch layer shapes: fc1: Linear(3, 64), fc2: Linear(64, 32),
    # fc3: Linear(32, 1), stored in kernel-friendly layouts (biases as
    # [N, 1] columns, fc3.weight transposed to [32, 1]).
    # TODO(synk): init is normal*0.1 (shape-compatible), not PyTorch's default
    # Kaiming-uniform; forward semantics are unchanged.
    k1, k2, k3, k4, k5, k6 = jax.random.split(key, 6)
    w1 = jax.random.normal(k1, (64, 3), jnp.float32) * 0.1    # fc1.weight
    b1 = jax.random.normal(k2, (64, 1), jnp.float32) * 0.1    # fc1.bias
    w2 = jax.random.normal(k3, (32, 64), jnp.float32) * 0.1   # fc2.weight
    b2 = jax.random.normal(k4, (32, 1), jnp.float32) * 0.1    # fc2.bias
    w3 = jax.random.normal(k5, (32, 1), jnp.float32) * 0.1    # fc3.weight.T
    b3 = jax.random.normal(k6, (1, 1), jnp.float32) * 0.1     # fc3.bias
    return (w1, b1, w2, b2, w3, b3)


def _reference_f32(x, params):
    """Pure-f32 reference == the PyTorch module's forward (up to f32 rounding)."""
    w1, b1, w2, b2, w3, b3 = params
    h1 = jnp.maximum(x @ w1.T + b1[:, 0], 0.0)
    h2 = jnp.maximum(h1 @ w2.T + b2[:, 0], 0.0)
    return h2 @ w3 + b3[0]


def _reference_mirrored(x, params, l1_dtype):
    """Replicates the kernel's dtype/op structure (bf16 x & W2, f32 accum)."""
    w1, b1, w2, b2, w3, b3 = params
    xT = x.astype(jnp.bfloat16).T.astype(l1_dtype)                 # [3, B]
    w1c = w1.astype(l1_dtype)
    b1c = b1.astype(l1_dtype)
    h1 = (w1c[:, 0:1] * xT[0:1, :] + w1c[:, 1:2] * xT[1:2, :]
          + w1c[:, 2:3] * xT[2:3, :] + b1c)
    h1 = jnp.maximum(h1, 0.0).astype(jnp.bfloat16)                 # [64, B]
    h2 = jnp.dot(w2.astype(jnp.bfloat16), h1,
                 preferred_element_type=jnp.float32) + b2
    h2 = jnp.maximum(h2, 0.0)                                      # [32, B]
    return (jnp.sum(w3 * h2, axis=0, keepdims=True) + b3).T        # [B, 1]


if __name__ == "__main__":
    key = jax.random.PRNGKey(0)
    kx, kp = jax.random.split(key)

    B = 200  # small; not a lane multiple -> exercises padding + the 2-tile grid
    x = jax.random.normal(kx, (B, 3), jnp.float32)
    params = init_params(kp)

    out = regression_model_forward(x, params)
    out = jax.block_until_ready(out)
    assert out.shape == (B, 1), out.shape

    # Tight check: reference with the same bf16 casts / op structure.
    ref_m = _reference_mirrored(x, params, _layer1_dtype())
    assert jnp.allclose(out, ref_m, atol=2e-3, rtol=2e-3), "mismatch vs mirrored ref"

    # Loose check vs the true fp32 module (bf16 input/weight precision contract).
    ref_f = _reference_f32(x, params)
    assert jnp.allclose(out, ref_f, atol=1e-2, rtol=5e-2), "mismatch vs f32 ref"

    print("KERNEL_OK")
</pallas_src>

<mosaic_0001>
module attributes {stable_mosaic.version = 11 : i64} {
  func.func @kernel(%arg0: i32, %arg1: memref<3x128xbf16, #tpu.memory_space<vmem>>, %arg2: memref<64x3xbf16, #tpu.memory_space<vmem>>, %arg3: memref<64x1xbf16, #tpu.memory_space<vmem>>, %arg4: memref<32x64xbf16, #tpu.memory_space<vmem>>, %arg5: memref<32x1xf32, #tpu.memory_space<vmem>>, %arg6: memref<32x1xf32, #tpu.memory_space<vmem>>, %arg7: memref<1x1xf32, #tpu.memory_space<vmem>>, %arg8: memref<1x128xf32, #tpu.memory_space<vmem>>) attributes {dimension_semantics = [#tpu.dimension_semantics<parallel>], iteration_bounds = array<i64: 2>, scalar_prefetch = 0 : i64, scratch_operands = 0 : i64, tpu.core_type = #tpu.core_type<tc>, window_params = [{transform_indices = @transform_0, window_bounds = array<i64: 3, 128>}, {pipeline_mode = #tpu.pipeline_mode<synchronous>, transform_indices = @transform_1, window_bounds = array<i64: 64, 3>}, {pipeline_mode = #tpu.pipeline_mode<synchronous>, transform_indices = @transform_2, window_bounds = array<i64: 64, 1>}, {pipeline_mode = #tpu.pipeline_mode<synchronous>, transform_indices = @transform_3, window_bounds = array<i64: 32, 64>}, {pipeline_mode = #tpu.pipeline_mode<synchronous>, transform_indices = @transform_4, window_bounds = array<i64: 32, 1>}, {pipeline_mode = #tpu.pipeline_mode<synchronous>, transform_indices = @transform_5, window_bounds = array<i64: 32, 1>}, {pipeline_mode = #tpu.pipeline_mode<synchronous>, transform_indices = @transform_6, window_bounds = array<i64: 1, 1>}, {transform_indices = @transform_7, window_bounds = array<i64: 1, 128>}]} {
    %c0 = arith.constant 0 : index
    %c0_0 = arith.constant 0 : index
    %0 = vector.load %arg1[%c0, %c0_0] : memref<3x128xbf16, #tpu.memory_space<vmem>>, vector<3x128xbf16>
    %c0_1 = arith.constant 0 : index
    %c0_2 = arith.constant 0 : index
    %1 = vector.load %arg2[%c0_1, %c0_2] : memref<64x3xbf16, #tpu.memory_space<vmem>>, vector<64x3xbf16>
    %2 = vector.extract_strided_slice %1 {offsets = [0, 0], sizes = [64, 1], strides = [1, 1]} : vector<64x3xbf16> to vector<64x1xbf16>
    %3 = vector.extract_strided_slice %0 {offsets = [0, 0], sizes = [1, 128], strides = [1, 1]} : vector<3x128xbf16> to vector<1x128xbf16>
    %4 = vector.broadcast %2 : vector<64x1xbf16> to vector<64x128xbf16>
    %5 = vector.broadcast %3 : vector<1x128xbf16> to vector<64x128xbf16>
    %6 = arith.mulf %4, %5 : vector<64x128xbf16>
    %7 = vector.extract_strided_slice %1 {offsets = [0, 1], sizes = [64, 1], strides = [1, 1]} : vector<64x3xbf16> to vector<64x1xbf16>
    %8 = vector.extract_strided_slice %0 {offsets = [1, 0], sizes = [1, 128], strides = [1, 1]} : vector<3x128xbf16> to vector<1x128xbf16>
    %9 = vector.broadcast %7 : vector<64x1xbf16> to vector<64x128xbf16>
    %10 = vector.broadcast %8 : vector<1x128xbf16> to vector<64x128xbf16>
    %11 = arith.mulf %9, %10 : vector<64x128xbf16>
    %12 = arith.addf %6, %11 : vector<64x128xbf16>
    %13 = vector.extract_strided_slice %1 {offsets = [0, 2], sizes = [64, 1], strides = [1, 1]} : vector<64x3xbf16> to vector<64x1xbf16>
    %14 = vector.extract_strided_slice %0 {offsets = [2, 0], sizes = [1, 128], strides = [1, 1]} : vector<3x128xbf16> to vector<1x128xbf16>
    %15 = vector.broadcast %13 : vector<64x1xbf16> to vector<64x128xbf16>
    %16 = vector.broadcast %14 : vector<1x128xbf16> to vector<64x128xbf16>
    %17 = arith.mulf %15, %16 : vector<64x128xbf16>
    %18 = arith.addf %12, %17 : vector<64x128xbf16>
    %c0_3 = arith.constant 0 : index
    %c0_4 = arith.constant 0 : index
    %19 = vector.load %arg3[%c0_3, %c0_4] : memref<64x1xbf16, #tpu.memory_space<vmem>>, vector<64x1xbf16>
    %20 = vector.broadcast %19 : vector<64x1xbf16> to vector<64x128xbf16>
    %21 = arith.addf %18, %20 : vector<64x128xbf16>
    %cst = arith.constant 0.000000e+00 : bf16
    %22 = vector.broadcast %cst : bf16 to vector<64x128xbf16>
    %23 = arith.maximumf %21, %22 : vector<64x128xbf16>
    %c0_5 = arith.constant 0 : index
    %c0_6 = arith.constant 0 : index
    %24 = vector.load %arg4[%c0_5, %c0_6] : memref<32x64xbf16, #tpu.memory_space<vmem>>, vector<32x64xbf16>
    %cst_7 = arith.constant dense<0.000000e+00> : vector<32x128xf32>
    %25 = tpu.matmul %24, %23, %cst_7 {dimension_numbers = #tpu.dot_dimension_numbers<[1], [0], [0], [1], [0, 0, 1, 1], [], []>} : vector<32x64xbf16>, vector<64x128xbf16>, vector<32x128xf32> -> vector<32x128xf32>
    %c0_8 = arith.constant 0 : index
    %c0_9 = arith.constant 0 : index
    %26 = vector.load %arg5[%c0_8, %c0_9] : memref<32x1xf32, #tpu.memory_space<vmem>>, vector<32x1xf32>
    %27 = vector.broadcast %26 : vector<32x1xf32> to vector<32x128xf32>
    %28 = arith.addf %25, %27 : vector<32x128xf32>
    %cst_10 = arith.constant 0.000000e+00 : f32
    %29 = vector.broadcast %cst_10 : f32 to vector<32x128xf32>
    %30 = arith.maximumf %28, %29 : vector<32x128xf32>
    %c0_11 = arith.constant 0 : index
    %c0_12 = arith.constant 0 : index
    %31 = vector.load %arg6[%c0_11, %c0_12] : memref<32x1xf32, #tpu.memory_space<vmem>>, vector<32x1xf32>
    %32 = vector.broadcast %31 : vector<32x1xf32> to vector<32x128xf32>
    %33 = arith.mulf %32, %30 : vector<32x128xf32>
    %cst_13 = arith.constant dense<0.000000e+00> : vector<128xf32>
    %34 = vector.multi_reduction <add>, %33, %cst_13 [0] : vector<32x128xf32> to vector<128xf32>
    %35 = vector.shape_cast %34 : vector<128xf32> to vector<1x128xf32>
    %c0_14 = arith.constant 0 : index
    %c0_15 = arith.constant 0 : index
    %36 = vector.load %arg7[%c0_14, %c0_15] : memref<1x1xf32, #tpu.memory_space<vmem>>, vector<1x1xf32>
    %37 = vector.broadcast %36 : vector<1x1xf32> to vector<1x128xf32>
    %38 = arith.addf %35, %37 : vector<1x128xf32>
    %c0_16 = arith.constant 0 : index
    %c0_17 = arith.constant 0 : index
    %39 = vector.load %arg8[%c0_16, %c0_17] : memref<1x128xf32, #tpu.memory_space<vmem>>, vector<1x128xf32>
    tpu.vector_store %arg8[%c0_16, %c0_17], %38 {strides = array<i32>} : memref<1x128xf32, #tpu.memory_space<vmem>>, vector<1x128xf32>,
    return
  }
  func.func @transform_0(%arg0: i32) -> (i32, i32) {
    %c0_i32 = arith.constant 0 : i32
    %c0_i32_0 = arith.constant 0 : i32
    return %c0_i32, %arg0 : i32, i32
  }
  func.func @transform_1(%arg0: i32) -> (i32, i32) {
    %c0_i32 = arith.constant 0 : i32
    %c0_i32_0 = arith.constant 0 : i32
    %c0_i32_1 = arith.constant 0 : i32
    return %c0_i32, %c0_i32_0 : i32, i32
  }
  func.func @transform_2(%arg0: i32) -> (i32, i32) {
    %c0_i32 = arith.constant 0 : i32
    %c0_i32_0 = arith.constant 0 : i32
    %c0_i32_1 = arith.constant 0 : i32
    return %c0_i32, %c0_i32_0 : i32, i32
  }
  func.func @transform_3(%arg0: i32) -> (i32, i32) {
    %c0_i32 = arith.constant 0 : i32
    %c0_i32_0 = arith.constant 0 : i32
    %c0_i32_1 = arith.constant 0 : i32
    return %c0_i32, %c0_i32_0 : i32, i32
  }
  func.func @transform_4(%arg0: i32) -> (i32, i32) {
    %c0_i32 = arith.constant 0 : i32
    %c0_i32_0 = arith.constant 0 : i32
    %c0_i32_1 = arith.constant 0 : i32
    return %c0_i32, %c0_i32_0 : i32, i32
  }
  func.func @transform_5(%arg0: i32) -> (i32, i32) {
    %c0_i32 = arith.constant 0 : i32
    %c0_i32_0 = arith.constant 0 : i32
    %c0_i32_1 = arith.constant 0 : i32
    return %c0_i32, %c0_i32_0 : i32, i32
  }
  func.func @transform_6(%arg0: i32) -> (i32, i32) {
    %c0_i32 = arith.constant 0 : i32
    %c0_i32_0 = arith.constant 0 : i32
    %c0_i32_1 = arith.constant 0 : i32
    return %c0_i32, %c0_i32_0 : i32, i32
  }
  func.func @transform_7(%arg0: i32) -> (i32, i32) {
    %c0_i32 = arith.constant 0 : i32
    %c0_i32_0 = arith.constant 0 : i32
    return %c0_i32, %arg0 : i32, i32
  }
}

</mosaic_0001>

<bundles_post_ra>
// kernel: regression_model_forward.1
= control target key start
LH: loop header
LB: loop body
LE: loop exit
PB: predicated region body
PF: predicated region fallthrough
CT: control target
= control target key end

     0   :  { %s1085_s26 = smov 0   ;;  %s1289_s0 = inlined_call_operand.vmem [shape: bf16[3,256], index: 0, kind: input, shape index: {}]   ;;  %s1290_s1 = inlined_call_operand.vmem [shape: bf16[64,3], index: 1, kind: input, shape index: {}]   ;;  %s1291_s2 = inlined_call_operand.vmem [shape: bf16[64,1], index: 2, kind: input, shape index: {}]   ;;  %s1292_s3 = inlined_call_operand.vmem [shape: bf16[32,64], index: 3, kind: input, shape index: {}]   ;;  %s1293_s4 = inlined_call_operand.vmem [shape: f32[32,1], index: 4, kind: input, shape index: {}]   ;;  %s1294_s5 = inlined_call_operand.vmem [shape: f32[32,1], index: 5, kind: input, shape index: {}]   ;;  %s1295_s6 = inlined_call_operand.<no memory space> [shape: f32[1,1], index: 6, kind: input, shape index: {}]   ;;  %s1296_s7 = inlined_call_operand.vmem [shape: f32[1,256], index: 7, kind: output, shape index: {}]  }
   0x1   :  { %v12_v0 = vstv %s1295_s6 }
   0x2   :  { %13 = vst [vmem:[#allocation2] sm:$0x1] %v12_v0 }
   0x3 LB: > { %s964_s27 = sadd.s32 4294967295, %s1036_s26   ;;  %p968_p0 = scmp.ge.s32.totalorder %s1036_s26, 1  ;;  %s1036_s26 = sphi %s1085_s26, %s19_s26  }
   0x4   : > { %p238_p1 = scmp.lt.s32.totalorder %s1036_s26, 3 }
   0x6   : > { %p239_p2 = pnand %p968_p0, %p238_p1 }
   0x7   : > { %v276_v1 = vld [vmem:[%s1290_s1] sm:$0xf] (!%p239_p2)  ;;  %v1038_v2 = vmov (!%p239_p2), 2   ;;  %v1039_v3 = vmov (!%p239_p2), 1   ;;  %v278_v4 = vld [vmem:[%s1290_s1 + $0x8] sm:$0xf] (!%p239_p2)  ;;  %v292_v34 = vlaneseq (!%p239_p2) }
   0x8   : > { %242 = sbr.rel (%p239_p2) target bundleno = 478 (0x1de), region = 48  ;;  %1014 = vset.pattern.permute.xlu0 (!%p239_p2), %v1038_v2  ;;  %1013 = vset.pattern.permute.xlu1 (!%p239_p2), %v1039_v3  ;;  %v277_v5 = vld [vmem:[%s1290_s1 + $0x4] sm:$0xf] (!%p239_p2)  ;;  %v281_v6 = vld [vmem:[%s1290_s1 + $0x14] sm:$0xf] (!%p239_p2)  ;;  %v1040_v8 = vmov (!%p239_p2), 0  }
   0x9   : > { %515 = vperm.xlu0 (!%p239_p2), %1014, %v276_v1   ;;  %400 = vperm.xlu1 (!%p239_p2), %1013, %v276_v1   ;;  %v280_v7 = vld [vmem:[%s1290_s1 + $0x10] sm:$0xf] (!%p239_p2)  ;;  %v283_v9 = vld [vmem:[%s1290_s1 + $0x1c] sm:$0xf] (!%p239_p2)  ;;  %v279_v10 = vld [vmem:[%s1290_s1 + $0xc] sm:$0xf] (!%p239_p2) }
   0xa   : > { %v626_v11 = vld [vmem:[%s1291_s2] sm:$0xf] (!%p239_p2)  ;;  %v627_v12 = vld [vmem:[%s1291_s2 + $0x4] sm:$0xf] (!%p239_p2)  ;;  %v282_v13 = vld [vmem:[%s1290_s1 + $0x18] sm:$0xf] (!%p239_p2) }
   0xb   : > { %v630_v14 = vld [vmem:[%s1291_s2 + $0x10] sm:$0xf] (!%p239_p2)  ;;  %v633_v15 = vld [vmem:[%s1291_s2 + $0x1c] sm:$0xf] (!%p239_p2)  ;;  %v751_v16 = vld [vmem:[%s1293_s4 + $0x8] sm:$0xff] (!%p239_p2)  ;;  %vm808_vm0 = vcmask (!%p239_p2), 523264  }
   0xc   : > { %v753_v17 = vld [vmem:[%s1293_s4 + $0x18] sm:$0xff] (!%p239_p2)  ;;  %v628_v18 = vld [vmem:[%s1291_s2 + $0x8] sm:$0xf] (!%p239_p2)  ;;  %v629_v20 = vld [vmem:[%s1291_s2 + $0xc] sm:$0xf] (!%p239_p2)  ;;  %p267_p3 = scmp.lt.s32.totalorder (!%p239_p2), %s964_s27, 1 }
   0xd   : > { %537 = vperm.xlu0 (!%p239_p2), %1014, %v278_v4   ;;  %411 = vperm.xlu1 (!%p239_p2), %1013, %v277_v5   ;;  %v869_v19 = vld [vmem:[%s1294_s5 + $0x8] sm:$0xff] (!%p239_p2)  ;;  %v871_v21 = vld [vmem:[%s1294_s5 + $0x18] sm:$0xff] (!%p239_p2)  ;;  %v631_v22 = vld [vmem:[%s1291_s2 + $0x14] sm:$0xf] (!%p239_p2)  ;;  %v1041_v38 = vmov (!%p239_p2), 839922192  }
   0xe   : > { %v632_v23 = vld [vmem:[%s1291_s2 + $0x18] sm:$0xf] (!%p239_p2)  ;;  %v750_v24 = vld [vmem:[%s1293_s4] sm:$0xff] (!%p239_p2)  ;;  %v752_v25 = vld [vmem:[%s1293_s4 + $0x10] sm:$0xff] (!%p239_p2)  ;;  %v290_v39 = vunpack.c.l.s4 (!%p239_p2), %v1041_v38  ;;  %v293_v40 = vshrl.u32 (!%p239_p2), %v292_v34, 7 }
   0xf   : > { %v868_v26 = vld [vmem:[%s1294_s5] sm:$0xff]  ;;  %v870_v28 = vld [vmem:[%s1294_s5 + $0x10] sm:$0xff]  ;;  %s1298_s27 = smov (!%p267_p3, %s964_s27), 1 }
  0x10   : > { %v1028_v27 = vld [vmem:[%s1292_s3] sm:$0xff]   ;;  %s969_s10 = sshll.u32 %s1298_s27, 1  ;;  %v291_v44 = vunpack.c.0.s8 %v290_v39  ;;  %v1195_v45 = vsub.s32 0, %v293_v40  ;;  %v604_v52 = vsub.s32 1, %v293_v40  ;;  %s273_s18 = scalar_lea.vmem %s1296_s7, %s1298_s27 }
  0x11   : > { %570 = vperm.xlu0 %1014, %v281_v6   ;;  %1015 = vset.pattern.permute.xlu1 %v1038_v2  ;;  %v905_v29 = vld [vmem:[#allocation2] sm:$0x1]  ;;  %s270_s13 = scalar_lea.vmem %s1289_s0, %s969_s10 }
  0x12   : > { %526 = vperm.xlu1 %1015, %v277_v5   ;;  %997 = vmatprep.mubr.msk.bf16.mxu0 %vm808_vm0, %v1028_v27  ;;  %v275_v36 = vld [vmem:[%s270_s13] sm:$0x3]  ;;  %v1199_v50 = vsub.s32 %v291_v44, %v293_v40 }
  0x13   : > { %v487_v41 = vshrl.u32 %v275_v36, 16  ;;  %v381_v48 = vpack.i.b16 %v275_v36, %v275_v36 }
  0x15   : > { %1022 = vset.pattern.permute.xlu0 %v1039_v3  ;;  %v488_v46 = vpack.i.b16 %v487_v41, %v487_v41  ;;  %v386_v53 = vrot.slane %v381_v48, %v1195_v45  ;;  %v605_v59 = vrot.slane %v381_v48, %v604_v52 }
  0x16   : > { %444 = vperm.xlu0 %1022, %v280_v7   ;;  %1016 = vset.pattern.permute.xlu1 %v1040_v8 }
  0x17   : > { %310 = vperm.xlu1 %1016, %v278_v4   ;;  %v493_v51 = vrot.slane %v488_v46, %v1195_v45  ;;  %v1207_v60 = vcombine.low %v386_v53, %v386_v53 }
  0x19   : > { %v1205_v58 = vcombine.low %v493_v51, %v493_v51 }
  0x1a   : > { %477 = vperm.xlu0 %1022, %v283_v9  }
  0x1b   : > { %1017 = vset.pattern.permute.xlu1 %v1039_v3 }
  0x1c   : > { %422 = vperm.xlu1 %1017, %v278_v4  }
  0x1e   : > { %1025 = vset.pattern.permute.xlu0 %v1040_v8 }
  0x1f   : > { %286 = vperm.xlu0 %1025, %v276_v1  }
  0x20   : > { %433 = vperm.xlu1 %1017, %v279_v10  }
  0x23   : > { %298 = vperm.xlu0 %1025, %v277_v5  }
  0x24   : > { %1018 = vset.pattern.permute.xlu1 %v1038_v2 }
  0x25   : > { %548 = vperm.xlu1 %1018, %v279_v10  }
  0x27   : > { %322 = vperm.xlu0 %1025, %v279_v10  }
  0x29   : > { %1019 = vset.pattern.permute.xlu1 %v1040_v8 }
  0x2a   : > { %636 = vperm.xlu1 %1019, %v626_v11  }
  0x2b   : > { %648 = vperm.xlu0 %1025, %v627_v12  }
  0x2e   : > { %334 = vperm.xlu1 %1019, %v280_v7  }
  0x2f   : > { %358 = vperm.xlu0 %1025, %v282_v13  }
  0x32   : > { %346 = vperm.xlu1 %1019, %v281_v6  }
  0x33   : > { %684 = vperm.xlu0 %1025, %v630_v14  }
  0x36   : > { %1020 = vset.pattern.permute.xlu1 %v1039_v3 }
  0x37   : > { %455 = vperm.xlu1 %1020, %v281_v6   ;;  %720 = vperm.xlu0 %1025, %v633_v15  }
  0x3b   : > { %1021 = vset.pattern.permute.xlu1 %v1038_v2  ;;  %761 = vperm.xlu0 %1025, %v751_v16  }
  0x3c   : > { %559 = vperm.xlu1 %1021, %v280_v7  }
  0x3f   : > { %771 = vperm.xlu0 %1025, %v753_v17  }
  0x40   : > { %1023 = vset.pattern.permute.xlu1 %v1040_v8 }
  0x41   : > { %660 = vperm.xlu1 %1023, %v628_v18  }
  0x43   : > { %879 = vperm.xlu0 %1025, %v869_v19  }
  0x45   : > { %672 = vperm.xlu1 %1023, %v629_v20  }
  0x47   : > { %889 = vperm.xlu0 %1025, %v871_v21  }
  0x49   : > { %370 = vperm.xlu1 %1023, %v283_v9  }
  0x4d   : > { %1024 = vset.pattern.permute.xlu1 %v1039_v3  ;;  %v1214_v3 = vcombine.low %v605_v59, %v605_v59 }
  0x4e   : > { %466 = vperm.xlu1 %1024, %v282_v13  }
  0x52   : > { %1026 = vset.pattern.permute.xlu1 %v1038_v2 }
  0x53   : > { %581 = vperm.xlu1 %1026, %v282_v13  }
  0x57   : > { %592 = vperm.xlu1 %1026, %v283_v9  }
  0x5b   : > { %1027 = vset.pattern.permute.xlu1 %v1040_v8 }
  0x5c   : > { %696 = vperm.xlu1 %1027, %v631_v22  }
  0x60   : > { %708 = vperm.xlu1 %1027, %v632_v23  }
  0x64   : > { %756 = vperm.xlu1 %1027, %v750_v24  }
  0x68   : > { %766 = vperm.xlu1 %1027, %v752_v25  }
  0x6c   : > { %874 = vperm.xlu1 %1027, %v868_v26  }
  0x70   : > { %884 = vperm.xlu1 %1027, %v870_v28  }
  0x74   : > { %908 = vperm.xlu1 %1027, %v905_v29  }
  0x88   : > { %v401_v30 = vpop.permute.xlu1 %400  ;;  %v516_v31 = vpop.permute.xlu0 %515 }
  0x89   : > { %v409_v57 = vrot.slane %v401_v30, %v1199_v50  ;;  %v524_v62 = vrot.slane %v516_v31, %v1199_v50 }
  0x8b   : > { %v498_v2 = vmul.bf16 %v1205_v58, %v409_v57  ;;  %v610_v9 = vmul.bf16 %v1214_v3, %v524_v62 }
  0x8c   : > { %v412_v32 = vpop.permute.xlu1 %411  ;;  %v1186_v33 = vpop.permute.xlu0 %537 }
  0x8d   : > { %v420_v61 = vrot.slane %v412_v32, %v1199_v50  ;;  %v546_v31 = vrot.slane %v1186_v33, %v1199_v50 }
  0x8f   : > { %v499_v5 = vmul.bf16 %v1205_v58, %v420_v61  ;;  %v612_v39 = vmul.bf16 %v1214_v3, %v546_v31 }
  0x90   : > { %v1191_v35 = vpop.permute.xlu0 %570 }
  0x91   : > { %v527_v37 = vpop.permute.xlu1 %526 }
  0x92   : > { %v535_v6 = vrot.slane %v527_v37, %v1199_v50 }
  0x94   : > { %v611_v13 = vmul.bf16 %v1214_v3, %v535_v6 }
  0x95   : > { %v1193_v42 = vpop.permute.xlu0 %444 }
  0x96   : > { %v311_v43 = vpop.permute.xlu1 %310  ;;  %v453_v62 = vrot.slane %v1193_v42, %v1199_v50 }
  0x97   : > { %v319_v29 = vrot.slane %v311_v43, %v1199_v50 }
  0x99   : > { %v1197_v47 = vpop.permute.xlu0 %477  ;;  %v393_v37 = vmul.bf16 %v1207_v60, %v319_v29 }
  0x9b   : > { %v423_v49 = vpop.permute.xlu1 %422 }
  0x9c   : > { %v431_v28 = vrot.slane %v423_v49, %v1199_v50 }
  0x9e   : > { %v287_v54 = vpop.permute.xlu0 %286  ;;  %v500_v32 = vmul.bf16 %v1205_v58, %v431_v28 }
  0x9f   : > { %v295_v55 = vrot.slane %v287_v54, %v1199_v50  ;;  %v434_v56 = vpop.permute.xlu1 %433 }
  0xa0   : > { %v442_v34 = vrot.slane %v434_v56, %v1199_v50  ;;  %v508_v40 = vadd.bf16 %v500_v32, %v393_v37 }
  0xa1   : > { %v391_v63 = vmul.bf16 %v1207_v60, %v295_v55 }
  0xa2   : > { %v299_v0 = vpop.permute.xlu0 %298  ;;  %v501_v41 = vmul.bf16 %v1205_v58, %v442_v34  ;;  %v620_v49 = vadd.bf16 %v612_v39, %v508_v40 }
  0xa3   : > { %v307_v1 = vrot.slane %v299_v0, %v1199_v50  ;;  %v506_v10 = vadd.bf16 %v498_v2, %v391_v63 }
  0xa4   : > { %v549_v4 = vpop.permute.xlu1 %548 }
  0xa5   : > { %v392_v7 = vmul.bf16 %v1207_v60, %v307_v1  ;;  %v618_v15 = vadd.bf16 %v610_v9, %v506_v10  ;;  %v557_v43 = vrot.slane %v549_v4, %v1199_v50 }
  0xa6   : > { %v323_v11 = vpop.permute.xlu0 %322 }
  0xa7   : > { %v507_v12 = vadd.bf16 %v499_v5, %v392_v7  ;;  %v331_v30 = vrot.slane %v323_v11, %v1199_v50  ;;  %v613_v48 = vmul.bf16 %v1214_v3, %v557_v43  ;;  %v502_v5 = vmul.bf16 %v1205_v58, %v453_v62 }
  0xa8   : > { %v486_v11 = vrot.slane %v1197_v47, %v1199_v50 }
  0xa9   : > { %v637_v14 = vpop.permute.xlu1 %636  ;;  %v619_v18 = vadd.bf16 %v611_v13, %v507_v12  ;;  %v394_v38 = vmul.bf16 %v1207_v60, %v331_v30 }
  0xaa   : > { %v645_v16 = vrot.slane %v637_v14, %v1199_v50  ;;  %v649_v17 = vpop.permute.xlu0 %648  ;;  %v579_v14 = vrot.slane %v1191_v35, %v1199_v50 }
  0xab   : > { %v657_v19 = vrot.slane %v649_v17, %v1199_v50  ;;  %v509_v46 = vadd.bf16 %v501_v41, %v394_v38 }
  0xac   : > { %v730_v20 = vadd.bf16 %v645_v16, %v618_v15 }
  0xad   : > { %v731_v21 = vadd.bf16 %v657_v19, %v619_v18  ;;  %v335_v22 = vpop.permute.xlu1 %334  ;;  %v621_v53 = vadd.bf16 %v613_v48, %v509_v46 }
  0xae   : > { %v738_v23 = vmax.bf16 %v1040_v8, %v730_v20  ;;  %v343_v63 = vrot.slane %v335_v22, %v1199_v50  ;;  %v359_v2 = vpop.permute.xlu0 %358 }
  0xaf   : > { %v739_v24 = vmax.bf16 %v1040_v8, %v731_v21  ;;  %v367_v20 = vrot.slane %v359_v2, %v1199_v50 }
  0xb0   : > { %v395_v6 = vmul.bf16 %v1207_v60, %v343_v63 }
  0xb1   : > { %v347_v25 = vpop.permute.xlu1 %346  ;;  %v975_v26 = vcombine.low %v738_v23, %v739_v24  ;;  %v505_v23 = vmul.bf16 %v1205_v58, %v486_v11  ;;  %v397_v29 = vmul.bf16 %v1207_v60, %v367_v20 }
  0xb2   : > { %v355_v7 = vrot.slane %v347_v25, %v1199_v50  ;;  %v510_v13 = vadd.bf16 %v502_v5, %v395_v6  ;;  %v685_v16 = vpop.permute.xlu0 %684 }
  0xb3   : > { %989 = vmatprep.subr.bf16.mxu0 %v975_v26  ;;  %v693_v21 = vrot.slane %v685_v16, %v1199_v50 }
  0xb4   : > { %990 = vmatpush3.bf16.msra.mxu0 %v975_v26  ;;  %v396_v15 = vmul.bf16 %v1207_v60, %v355_v7  ;;  %v615_v26 = vmul.bf16 %v1214_v3, %v579_v14 }
  0xb6   : > { %v456_v27 = vpop.permute.xlu1 %455  ;;  %v721_v38 = vpop.permute.xlu0 %720 }
  0xb7   : > { %v464_v4 = vrot.slane %v456_v27, %v1199_v50  ;;  %v729_v39 = vrot.slane %v721_v38, %v1199_v50 }
  0xb9   : > { %v503_v12 = vmul.bf16 %v1205_v58, %v464_v4 }
  0xbb   : > { %v560_v36 = vpop.permute.xlu1 %559  ;;  %v511_v24 = vadd.bf16 %v503_v12, %v396_v15 }
  0xbc   : > { %v568_v1 = vrot.slane %v560_v36, %v1199_v50 }
  0xbd   : > { %v623_v36 = vadd.bf16 %v615_v26, %v511_v24 }
  0xbe   : > { %v614_v42 = vmul.bf16 %v1214_v3, %v568_v1 }
  0xc0   : > { %v661_v44 = vpop.permute.xlu1 %660  ;;  %v622_v22 = vadd.bf16 %v614_v42, %v510_v13 }
  0xc1   : > { %v669_v33 = vrot.slane %v661_v44, %v1199_v50 }
  0xc2   : > { %v734_v30 = vadd.bf16 %v693_v21, %v622_v22 }
  0xc3   : > { %v732_v52 = vadd.bf16 %v669_v33, %v620_v49 }
  0xc4   : > { %v673_v51 = vpop.permute.xlu1 %672  ;;  %v742_v44 = vmax.bf16 %v1040_v8, %v734_v30 }
  0xc5   : > { %v681_v54 = vrot.slane %v673_v51, %v1199_v50  ;;  %v740_v57 = vmax.bf16 %v1040_v8, %v732_v52 }
  0xc7   : > { %v733_v55 = vadd.bf16 %v681_v54, %v621_v53  ;;  %v1029_v53 = vld [vmem:[%s1292_s3 + $0x8] sm:$0xff]  }
  0xc8   : > { %v371_v56 = vpop.permute.xlu1 %370 }
  0xc9   : > { %v741_v59 = vmax.bf16 %v1040_v8, %v733_v55  ;;  %v379_v9 = vrot.slane %v371_v56, %v1199_v50  ;;  %v762_v55 = vpop.permute.xlu0 %761 }
  0xcb   : > { %v976_v61 = vcombine.low %v740_v57, %v741_v59  ;;  %v398_v17 = vmul.bf16 %v1207_v60, %v379_v9 }
  0xcd   : > { %v467_v0 = vpop.permute.xlu1 %466  ;;  %991 = vmatprep.subr.bf16.mxu0 %v976_v61  ;;  %v513_v27 = vadd.bf16 %v505_v23, %v398_v17  ;;  %v772_v56 = vpop.permute.xlu0 %771 }
  0xce   : > { %992 = vmatpush3.bf16.msra.mxu0 %v976_v61  ;;  %v475_v18 = vrot.slane %v467_v0, %v1199_v50 }
  0xd0   : > { %v504_v28 = vmul.bf16 %v1205_v58, %v475_v18 }
  0xd1   : > { %v880_v5 = vpop.permute.xlu0 %879 }
  0xd2   : > { %v582_v10 = vpop.permute.xlu1 %581  ;;  %v512_v40 = vadd.bf16 %v504_v28, %v397_v29 }
  0xd3   : > { %v590_v35 = vrot.slane %v582_v10, %v1199_v50 }
  0xd5   : > { %v616_v32 = vmul.bf16 %v1214_v3, %v590_v35  ;;  %v890_v14 = vpop.permute.xlu0 %889 }
  0xd6   : > { %v593_v19 = vpop.permute.xlu1 %592 }
  0xd7   : > { %v601_v47 = vrot.slane %v593_v19, %v1199_v50  ;;  %v624_v60 = vadd.bf16 %v616_v32, %v512_v40 }
  0xd9   : > { %v617_v25 = vmul.bf16 %v1214_v3, %v601_v47 }
  0xdb   : > { %v697_v31 = vpop.permute.xlu1 %696  ;;  %v625_v34 = vadd.bf16 %v617_v25, %v513_v27 }
  0xdc   : > { %v705_v37 = vrot.slane %v697_v31, %v1199_v50 }
  0xdd   : > { %v737_v46 = vadd.bf16 %v729_v39, %v625_v34 }
  0xde   : > { %v735_v41 = vadd.bf16 %v705_v37, %v623_v36 }
  0xdf   : > { %v709_v43 = vpop.permute.xlu1 %708  ;;  %v745_v51 = vmax.bf16 %v1040_v8, %v737_v46 }
  0xe0   : > { %v743_v58 = vmax.bf16 %v1040_v8, %v735_v41  ;;  %v717_v33 = vrot.slane %v709_v43, %v1199_v50 }
  0xe2   : > { %v736_v48 = vadd.bf16 %v717_v33, %v624_v60  ;;  %v977_v3 = vcombine.low %v742_v44, %v743_v58 }
  0xe3   : > { %v757_v54 = vpop.permute.xlu1 %756 }
  0xe4   : > { %v744_v49 = vmax.bf16 %v1040_v8, %v736_v48  ;;  %993 = vmatprep.subr.bf16.mxu0 %v977_v3 }
  0xe5   : > { %994 = vmatpush3.bf16.msra.mxu0 %v977_v3 }
  0xe6   : > { %v978_v52 = vcombine.low %v744_v49, %v745_v51 }
  0xe7   : > { %v767_v50 = vpop.permute.xlu1 %766 }
  0xe8   : > { %995 = vmatprep.subr.bf16.mxu0 %v978_v52 }
  0xe9   : > { %996 = vmatpush3.bf16.msra.mxu0 %v978_v52 }
  0xeb   : > { %v875_v8 = vpop.permute.xlu1 %874 }
  0xec   : > { %998 = vmatmul.mubr.msk.bf16.vlgmr.msra.gmra.mrb[0].mxu0 %vm808_vm0, %v1029_v53 }
  0xef   : > { %v885_v11 = vpop.permute.xlu1 %884 }
  0xf3   : > { %v909_v22 = vpop.permute.xlu1 %908 }
  0xf4   : > { %v914_v23 = vrot.slane %v909_v22, %v1195_v45 }
 0x1bf   : > { %v999_v57 = vpop.f32.mrb[0].mxu0 }
 0x1c0   : > { %v849_v59 = vpop.f32.mrb[1].mxu0  ;;  %v858_v61 = vadd.f32 %v999_v57, %v767_v50 }
 0x1c1   : > { %v850_v62 = vadd.f32 %v849_v59, %v757_v54  ;;  %v1000_v63 = vpop.f32.mrb[2].mxu0 }
 0x1c2   : > { %v852_v0 = vpop.f32.mrb[3].mxu0  ;;  %v861_v2 = vadd.f32 %v1000_v63, %v772_v56  ;;  %v866_v6 = vmax.f32 %v858_v61, 0.0 }
 0x1c3   : > { %v864_v1 = vmax.f32 %v850_v62, 0.0  ;;  %v853_v4 = vadd.f32 %v852_v0, %v762_v55 }
 0x1c4   : > { %v867_v10 = vmax.f32 %v861_v2, 0.0  ;;  %v894_v12 = vmul.f32 %v885_v11, %v866_v6 }
 0x1c5   : > { %v865_v7 = vmax.f32 %v853_v4, 0.0  ;;  %v892_v9 = vmul.f32 %v875_v8, %v864_v1 }
 0x1c6   : > { %v895_v15 = vmul.f32 %v890_v14, %v867_v10 }
 0x1c7   : > { %v893_v42 = vmul.f32 %v880_v5, %v865_v7 }
 0x1c9   : > { %v896_v13 = vadd.f32 %v893_v42, %v892_v9 }
 0x1cb   : > { %v897_v16 = vadd.f32 %v896_v13, %v894_v12 }
 0x1cd   : > { %v898_v17 = vadd.f32 %v897_v16, %v895_v15 }
 0x1cf   : > { %v899_v18 = vrot.slane %v898_v17, 4 }
 0x1d1   : > { %v900_v19 = vadd.f32 %v899_v18, %v898_v17 }
 0x1d3   : > { %v901_v20 = vrot.slane %v900_v19, 2 }
 0x1d5   : > { %v902_v21 = vadd.f32 %v901_v20, %v900_v19 }
 0x1d7   : > { %v903_v47 = vrot.slane %v902_v21, 1 }
 0x1d9   : > { %v904_v24 = vadd.f32 %v903_v47, %v902_v21 }
 0x1db   : > { %v915_v35 = vadd.f32 %v914_v23, %v904_v24 }
 0x1dd   : > { %916 = vst [vmem:[%s273_s18] sm:$0x1] %v915_v35 }
 0x1de PF: > { %s19_s26 = sadd.s32 1, %s1036_s26  }
 0x1df   : > { %p16_p4 = scmp.ge.s32.totalorder %s19_s26, 4  }
 0x1e1   :  { %18 = sbr.rel (!%p16_p4) target bundleno = 3 (0x3), region = 78 }

</bundles_post_ra>
